<compile_context>
chip_gen: v6e
topology: v6e:2x2x1
jax: 0.10.0
libtpu: 0.0.40
codegen_flags: <defaults>
</compile_context>

<pallas_src>
import functools

import jax
import jax.numpy as jnp
from jax import lax
from jax.experimental import pallas as pl
from jax.experimental.pallas import tpu as pltpu


_SUBLANE = 8
_LANE = 128
_SUBLANE_TILES = (1024, 512, 256, 128, 64, 32, 16, 8)
_LANE_TILES = (2048, 1024, 512, 256, 128)


def _physical_vmem_bytes():
    """Per-core VMEM capacity (clamped); conservative 64 MiB fallback (v7x)."""
    try:
        info = pltpu.get_tpu_info()
        cap = int(getattr(info, "vmem_capacity_bytes"))
        if cap > 0:
            return max(32 * 1024 * 1024, min(cap, 128 * 1024 * 1024))
    except Exception:
        pass
    return 64 * 1024 * 1024


def _tile_candidates(dim, unit, preferred):
    """Tiles that are multiples of `unit` dividing `dim`, plus the full dim
    (a full-extent block is always layout-legal regardless of alignment)."""
    cands = {t for t in preferred if t <= dim and t % unit == 0 and dim % t == 0}
    cands.add(dim)
    return sorted(cands, reverse=True)


# ---------------------------------------------------------------------------
# Linear projection kernel:  y = x @ W^T   (PyTorch nn.Linear, bias=False)
# Full M/N/K tiling; weight layout [D_out, D_in] consumed natively via
# dot_general (contracting last dims) — no transpose inside the kernel.
# f32 VMEM accumulator across the K ("arbitrary") axis.
# ---------------------------------------------------------------------------
def _linear_kernel(x_ref, w_ref, o_ref, acc_ref):
    @pl.when(pl.program_id(2) == 0)
    def _init():
        acc_ref[...] = jnp.zeros_like(acc_ref)

    acc_ref[...] += lax.dot_general(
        x_ref[...],
        w_ref[...],
        dimension_numbers=(((1,), (1,)), ((), ())),
        preferred_element_type=jnp.float32,
    )

    @pl.when(pl.program_id(2) == pl.num_programs(2) - 1)
    def _store():
        o_ref[...] = acc_ref[...].astype(o_ref.dtype)


def _pick_linear_tiles(M, D_out, D_in, itemsize, budget):
    tm_cands = _tile_candidates(M, _SUBLANE, _SUBLANE_TILES)
    tn_cands = _tile_candidates(D_out, _LANE, _LANE_TILES)
    tk_cands = _tile_candidates(D_in, _LANE, _LANE_TILES)

    def fits(tm, tn, tk):
        io = 2 * (tm * tk + tn * tk + tm * tn) * itemsize  # dbl-buffered x,w,o
        acc = 4 * tm * tn                                  # f32 accumulator
        return io + acc <= budget

    fitting = [(tm, tn, tk) for tm in tm_cands for tn in tn_cands
               for tk in tk_cands if fits(tm, tn, tk)]
    if not fitting:
        fitting = [(tm_cands[-1], tn_cands[-1], tk_cands[-1])]
    # Prefer configs whose parallel extent keeps both v7x TensorCores busy.
    multi = [c for c in fitting if (M // c[0]) * (D_out // c[1]) >= 2]
    pool = multi or fitting
    return max(pool, key=lambda c: (c[0] * c[1] * c[2], c[2]))


def linear(x, w, *, vmem_frac=0.70, limit_frac=0.85):
    """x: [M, D_in], w: [D_out, D_in] -> [M, D_out]."""
    M, D_in = x.shape
    D_out = w.shape[0]
    itemsize = max(jnp.dtype(x.dtype).itemsize, jnp.dtype(w.dtype).itemsize)
    phys = _physical_vmem_bytes()
    tm, tn, tk = _pick_linear_tiles(M, D_out, D_in, itemsize,
                                    int(vmem_frac * phys))
    grid = (M // tm, D_out // tn, D_in // tk)
    return pl.pallas_call(
        _linear_kernel,
        out_shape=jax.ShapeDtypeStruct((M, D_out), x.dtype),
        grid=grid,
        in_specs=[
            pl.BlockSpec((tm, tk), lambda i, j, kk: (i, kk)),
            pl.BlockSpec((tn, tk), lambda i, j, kk: (j, kk)),
        ],
        out_specs=pl.BlockSpec((tm, tn), lambda i, j, kk: (i, j)),
        scratch_shapes=[pltpu.VMEM((tm, tn), jnp.float32)],
        compiler_params=pltpu.CompilerParams(
            dimension_semantics=("parallel", "parallel", "arbitrary"),
            vmem_limit_bytes=int(limit_frac * phys),
        ),
    )(x, w)


# ---------------------------------------------------------------------------
# Flash-style attention core.
#   Grid = (N, Lq // tq, Lk // tk), kv axis innermost + "arbitrary".
#   Each step sees lane-dense tiles q:[tq, D], k/v:[tk, D] (D = H * Dh) and
#   iterates the heads with static slices.  Online-softmax state lives in a
#   single VMEM scratch acc_sc[h] = [acc | l] of width d_head+1: the
#   denominator l is produced by the PV matmul itself (ones column appended
#   to v_h) so no XLU lane-sum is needed per head.  Output is one lane-dense
#   [tq, D] store at the last kv step.
# ---------------------------------------------------------------------------
def _attn_kernel(q_ref, k_ref, v_ref, o_ref, m_sc, acc_sc, *, n_heads, d_head):
    kv_idx = pl.program_id(2)

    @pl.when(kv_idx == 0)
    def _init():
        m_sc[...] = jnp.full(m_sc.shape, -jnp.inf, dtype=m_sc.dtype)
        acc_sc[...] = jnp.zeros(acc_sc.shape, dtype=acc_sc.dtype)

    # Native dtype (bf16 stays bf16 -> full MXU rate); accumulation is f32 via
    # preferred_element_type.  Softmax scale is already folded into wq.
    q = q_ref[...]
    k = k_ref[...]
    v = v_ref[...]

    # Ones column used to fuse the softmax-denominator sum into the PV matmul
    # (rides MXU slack instead of the XLU lane reduction).  Hoisted out of the
    # head loop.
    ones_col = jnp.ones((v.shape[0], 1), dtype=v.dtype)

    for h in range(n_heads):  # static unroll over heads (small H)
        lo = h * d_head
        q_h = q[:, lo:lo + d_head]
        k_h = k[:, lo:lo + d_head]
        v_h = v[:, lo:lo + d_head]

        # s = q_h @ k_h^T via dot_general (contract last dims) — no XLU
        # transpose of the K tile.
        s = lax.dot_general(
            q_h, k_h,
            dimension_numbers=(((1,), (1,)), ((), ())),
            preferred_element_type=jnp.float32,
        )                                                   # [tq, tk] f32

        m_prev = m_sc[h]                                    # [tq, 1]
        m_new = jnp.maximum(m_prev, jnp.max(s, axis=-1, keepdims=True))
        alpha = jnp.exp(m_prev - m_new)                     # [tq, 1]
        p = jnp.exp(s - m_new)                              # [tq, tk] f32

        # [v_h | 1] so column d_head of the product is sum(p) (the l update).
        v_aug = jnp.concatenate([v_h, ones_col], axis=-1)   # [tk, Dh+1]
        pv = jnp.dot(p.astype(v.dtype), v_aug,
                     preferred_element_type=jnp.float32)    # [tq, Dh+1]

        acc_sc[h] = alpha * acc_sc[h] + pv
        m_sc[h] = m_new

    @pl.when(kv_idx == pl.num_programs(2) - 1)
    def _finalize():
        outs = []
        for h in range(n_heads):
            acc = acc_sc[h]                                 # [tq, Dh+1]
            inv_l = pl.reciprocal(acc[:, d_head:d_head + 1], approx=False)
            outs.append(acc[:, :d_head] * inv_l)
        # One lane-dense [tq, D] store (heads concatenated in-vreg).
        o_ref[...] = jnp.concatenate(outs, axis=-1).astype(o_ref.dtype)


def _pick_attention_tiles(N, Lq, Lk, D, n_heads, d_head, itemsize, budget):
    tq_cands = _tile_candidates(Lq, _SUBLANE, _SUBLANE_TILES)
    tk_cands = _tile_candidates(Lk, _SUBLANE, _SUBLANE_TILES)

    def fits(tq, tk):
        io = 2 * (2 * tq * D + 2 * tk * D) * itemsize    # dbl-buffered q,o,k,v
        scratch = 4 * n_heads * tq * (d_head + 2)        # f32 acc(+l) + m
        work = 4 * 3 * tq * tk                           # s/p/temporaries (f32)
        return io + scratch + work <= budget

    fitting = [(tq, tk) for tq in tq_cands for tk in tk_cands if fits(tq, tk)]
    if not fitting:
        fitting = [(tq_cands[-1], tk_cands[-1])]
    # Keep the parallel extent (N * n_q) >= 2 when possible (v7x megacore).
    multi = [c for c in fitting if N * (Lq // c[0]) >= 2]
    pool = multi or fitting
    return max(pool, key=lambda c: (c[0] * c[1], c[1]))


def attention_core(qp, kp, vp, n_heads, *, vmem_frac=0.70, limit_frac=0.85):
    """qp: [N, Lq, D], kp/vp: [N, Lk, D] -> [N, Lq, D] (D = n_heads * d_head)."""
    N, Lq, D = qp.shape
    Lk = kp.shape[1]
    d_head = D // n_heads

    itemsize = jnp.dtype(qp.dtype).itemsize
    phys = _physical_vmem_bytes()
    tq, tk = _pick_attention_tiles(N, Lq, Lk, D, n_heads, d_head, itemsize,
                                   int(vmem_frac * phys))
    n_q, n_kv = Lq // tq, Lk // tk

    kernel = functools.partial(_attn_kernel, n_heads=n_heads, d_head=d_head)

    # TODO(synk): add pipeline_mode=pl.Buffered(3) on k/v if profiling shows
    # exposed DMA on long-Lk mem-bound shapes (VMEM permitting).
    return pl.pallas_call(
        kernel,
        out_shape=jax.ShapeDtypeStruct((N, Lq, D), qp.dtype),
        grid=(N, n_q, n_kv),
        in_specs=[
            pl.BlockSpec((None, tq, D), lambda n, i, j: (n, i, 0)),
            pl.BlockSpec((None, tk, D), lambda n, i, j: (n, j, 0)),
            pl.BlockSpec((None, tk, D), lambda n, i, j: (n, j, 0)),
        ],
        out_specs=pl.BlockSpec((None, tq, D), lambda n, i, j: (n, i, 0)),
        scratch_shapes=[
            pltpu.VMEM((n_heads, tq, 1), jnp.float32),           # m (running max)
            pltpu.VMEM((n_heads, tq, d_head + 1), jnp.float32),  # [acc | l]
        ],
        compiler_params=pltpu.CompilerParams(
            dimension_semantics=("parallel", "parallel", "arbitrary"),
            vmem_limit_bytes=int(limit_frac * phys),
        ),
    )(qp, kp, vp)


# ---------------------------------------------------------------------------
# Full forward pass, mirroring Attention.forward exactly.
# ---------------------------------------------------------------------------
def attention_forward(q, k, v, wq, wk, wv, wo, n_heads):
    N, Lq, D = q.shape
    Lk = k.shape[1]
    scale = 1.0 / (D ** 0.5)          # matches `atten / d_model ** 0.5`

    # Fold the softmax scale into wq (O(D^2), once per call — would be done at
    # parameter-prep time in a real module) so the kernel never rescales the
    # resident q tile per kv step.
    wq_scaled = (wq * scale).astype(wq.dtype)

    # Projections (reshape [N,L,D]<->[N*L,D] is free — no data movement).
    qp = linear(q.reshape(N * Lq, D), wq_scaled).reshape(N, Lq, D)
    kp = linear(k.reshape(N * Lk, D), wk).reshape(N, Lk, D)
    vp = linear(v.reshape(N * Lk, D), wv).reshape(N, Lk, D)

    # Attention operates directly on the [N, L, D] layout (heads split inside
    # the kernel) — no wrapper transposes / HBM relayout passes.
    o = attention_core(qp, kp, vp, n_heads)                  # [N, Lq, D]

    return linear(o.reshape(N * Lq, D), wo).reshape(N, Lq, D)


# ---------------------------------------------------------------------------
# Pure-JAX reference (mirror of the PyTorch code) for verification.
# ---------------------------------------------------------------------------
def attention_reference(q, k, v, wq, wk, wv, wo, n_heads):
    N, Lq, D = q.shape
    Lk = k.shape[1]
    d_head = D // n_heads
    qp = (q @ wq.T).reshape(N, Lq, n_heads, d_head)
    kp = (k @ wk.T).reshape(N, Lk, n_heads, d_head)
    vp = (v @ wv.T).reshape(N, Lk, n_heads, d_head)
    atten = jnp.einsum("nqhd,nkhd->nhqk", qp, kp) / (D ** 0.5)
    atten = jax.nn.softmax(atten, axis=-1)
    out = jnp.einsum("nhqk,nkhd->nqhd", atten, vp).reshape(N, Lq, D)
    return out @ wo.T


if __name__ == "__main__":
    d_model = 32
    n_heads = 4
    N, Lq, Lk = 2, 8, 8

    key = jax.random.PRNGKey(0)
    kq, kk, kv, k1, k2, k3, k4 = jax.random.split(key, 7)

    q = jax.random.normal(kq, (N, Lq, d_model), dtype=jnp.float32)
    k = jax.random.normal(kk, (N, Lk, d_model), dtype=jnp.float32)
    v = jax.random.normal(kv, (N, Lk, d_model), dtype=jnp.float32)

    # Deterministic synthetic weights, nn.Linear layout [out_features, in_features].
    s = 1.0 / (d_model ** 0.5)
    wq = jax.random.normal(k1, (d_model, d_model), dtype=jnp.float32) * s
    wk = jax.random.normal(k2, (d_model, d_model), dtype=jnp.float32) * s
    wv = jax.random.normal(k3, (d_model, d_model), dtype=jnp.float32) * s
    wo = jax.random.normal(k4, (d_model, d_model), dtype=jnp.float32) * s

    out = attention_forward(q, k, v, wq, wk, wv, wo, n_heads)
    out = jax.block_until_ready(out)

    ref = attention_reference(q, k, v, wq, wk, wv, wo, n_heads)
    assert out.shape == (N, Lq, d_model)
    assert jnp.allclose(out, ref, atol=1e-4, rtol=1e-4), "mismatch vs reference"

    print("KERNEL_OK")
</pallas_src>

<mosaic_0001>
module attributes {stable_mosaic.version = 11 : i64} {
  func.func @_linear_kernel(%arg0: i32, %arg1: i32, %arg2: i32, %arg3: memref<8x32xf32, #tpu.memory_space<vmem>>, %arg4: memref<32x32xf32, #tpu.memory_space<vmem>>, %arg5: memref<8x32xf32, #tpu.memory_space<vmem>>, %arg6: memref<8x32xf32, #tpu.memory_space<vmem>>) attributes {dimension_semantics = [#tpu.dimension_semantics<parallel>, #tpu.dimension_semantics<parallel>, #tpu.dimension_semantics<arbitrary>], iteration_bounds = array<i64: 2, 1, 1>, scalar_prefetch = 0 : i64, scratch_operands = 1 : i64, tpu.core_type = #tpu.core_type<tc>, window_params = [{transform_indices = @transform_0, window_bounds = array<i64: 8, 32>}, {transform_indices = @transform_1, window_bounds = array<i64: 32, 32>}, {transform_indices = @transform_2, window_bounds = array<i64: 8, 32>}]} {
    %c0_i32 = arith.constant 0 : i32
    %0 = arith.cmpi eq, %arg2, %c0_i32 : i32
    %1 = arith.extui %0 : i1 to i32
    %c0_i32_0 = arith.constant 0 : i32
    %2 = arith.cmpi ne, %1, %c0_i32_0 : i32
    scf.if %2 {
      %cst_10 = arith.constant 0.000000e+00 : f32
      %12 = vector.broadcast %cst_10 : f32 to vector<8x32xf32>
      %c0_11 = arith.constant 0 : index
      %c0_12 = arith.constant 0 : index
      %13 = vector.load %arg6[%c0_11, %c0_12] : memref<8x32xf32, #tpu.memory_space<vmem>>, vector<8x32xf32>
      tpu.vector_store %arg6[%c0_11, %c0_12], %12 {strides = array<i32>} : memref<8x32xf32, #tpu.memory_space<vmem>>, vector<8x32xf32>,
    } else {
    }
    %c0 = arith.constant 0 : index
    %c0_1 = arith.constant 0 : index
    %3 = vector.load %arg6[%c0, %c0_1] : memref<8x32xf32, #tpu.memory_space<vmem>>, vector<8x32xf32>
    %c0_2 = arith.constant 0 : index
    %c0_3 = arith.constant 0 : index
    %4 = vector.load %arg3[%c0_2, %c0_3] : memref<8x32xf32, #tpu.memory_space<vmem>>, vector<8x32xf32>
    %c0_4 = arith.constant 0 : index
    %c0_5 = arith.constant 0 : index
    %5 = vector.load %arg4[%c0_4, %c0_5] : memref<32x32xf32, #tpu.memory_space<vmem>>, vector<32x32xf32>
    %cst = arith.constant dense<0.000000e+00> : vector<8x32xf32>
    %6 = tpu.matmul %4, %5, %cst {dimension_numbers = #tpu.dot_dimension_numbers<[1], [1], [0], [0], [0, 0, 1, 0], [], []>} : vector<8x32xf32>, vector<32x32xf32>, vector<8x32xf32> -> vector<8x32xf32>
    %7 = arith.addf %3, %6 : vector<8x32xf32>
    %c0_6 = arith.constant 0 : index
    %c0_7 = arith.constant 0 : index
    %8 = vector.load %arg6[%c0_6, %c0_7] : memref<8x32xf32, #tpu.memory_space<vmem>>, vector<8x32xf32>
    tpu.vector_store %arg6[%c0_6, %c0_7], %7 {strides = array<i32>} : memref<8x32xf32, #tpu.memory_space<vmem>>, vector<8x32xf32>,
    %c0_i32_8 = arith.constant 0 : i32
    %9 = arith.cmpi eq, %arg2, %c0_i32_8 : i32
    %10 = arith.extui %9 : i1 to i32
    %c0_i32_9 = arith.constant 0 : i32
    %11 = arith.cmpi ne, %10, %c0_i32_9 : i32
    scf.if %11 {
      %c0_10 = arith.constant 0 : index
      %c0_11 = arith.constant 0 : index
      %12 = vector.load %arg6[%c0_10, %c0_11] : memref<8x32xf32, #tpu.memory_space<vmem>>, vector<8x32xf32>
      %c0_12 = arith.constant 0 : index
      %c0_13 = arith.constant 0 : index
      %13 = vector.load %arg5[%c0_12, %c0_13] : memref<8x32xf32, #tpu.memory_space<vmem>>, vector<8x32xf32>
      tpu.vector_store %arg5[%c0_12, %c0_13], %12 {strides = array<i32>} : memref<8x32xf32, #tpu.memory_space<vmem>>, vector<8x32xf32>,
    } else {
    }
    return
  }
  func.func @transform_0(%arg0: i32, %arg1: i32, %arg2: i32) -> (i32, i32) {
    %c0_i32 = arith.constant 0 : i32
    return %arg0, %arg2 : i32, i32
  }
  func.func @transform_1(%arg0: i32, %arg1: i32, %arg2: i32) -> (i32, i32) {
    %c0_i32 = arith.constant 0 : i32
    return %arg1, %arg2 : i32, i32
  }
  func.func @transform_2(%arg0: i32, %arg1: i32, %arg2: i32) -> (i32, i32) {
    %c0_i32 = arith.constant 0 : i32
    return %arg0, %arg1 : i32, i32
  }
}

</mosaic_0001>

<bundles_post_ra>
// kernel: tpu_custom_call.1
= control target key start
LH: loop header
LB: loop body
LE: loop exit
PB: predicated region body
PF: predicated region fallthrough
CT: control target
= control target key end

     0   :  { %7 = vsyncpa [#allocation4], 0  ;;  %s887_s0 = inlined_call_operand.hbm [shape: f32[16,32], index: 0, kind: input, shape index: {}]   ;;  %s888_s1 = inlined_call_operand.hbm [shape: f32[32,32], index: 1, kind: input, shape index: {}]   ;;  %s889_s2 = inlined_call_operand.hbm [shape: f32[16,32], index: 2, kind: output, shape index: {}]  }
   0x1   :  { %9 = vsyncpa [#allocation4 + $0x1], 0 }
   0x2   :  { %10 = vsyncpa [#allocation7], 0 }
   0x3   :  { %11 = vsyncpa [#allocation5], 0 }
   0x4   :  { %13 = vsyncpa [#allocation5 + $0x1], 0  ;;  %s702_s9 = smov 0   ;;  %s704_s10 = smov 0  }
   0x5   :  { %s706_s11 = smov 0   ;;  %s708_s12 = smov 0  }
   0x6   :  { %s710_s13 = smov 0   ;;  %s712_s14 = smov 0  }
   0x7 LB: > { %s427_s15 = sadd.s32 4294967295, %s678_s14   ;;  %s428_s16 = sadd.s32 4294967294, %s678_s14   ;;  %s678_s14 = sphi %s712_s14, %s19_s14   ;;  %s674_s13 = sphi %s710_s13, %s907_s13   ;;  %s670_s12 = sphi %s708_s12, %s906_s12   ;;  %s666_s11 = sphi %s706_s11, %s905_s11   ;;  %s662_s10 = sphi %s704_s10, %s904_s10   ;;  %s658_s9 = sphi %s702_s9, %s903_s9  }
   0x8   : > { %p60_p0 = scmp.ne.s32.totalorder %s662_s10, %s658_s9  ;;  %p736_p1 = scmp.eq.s32.totalorder %s427_s15, 0 }
   0x9   : > { %p740_p2 = scmp.eq.s32.totalorder %s427_s15, 1  ;;  %p120_p3 = scmp.eq.s32.totalorder %s428_s16, 1 }
   0xa   : > { %p746_p4 = por %p736_p1, %p60_p0  ;;  %p429_p5 = scmp.ge.s32.totalorder %s678_s14, 1 }
   0xb   : > { %p751_p6 = por %p120_p3, %p60_p0  ;;  %p127_p7 = scmp.lt.s32.totalorder %s678_s14, 3 }
   0xc   : > { %s893_s19 = scalar_select %p746_p4, 1, 0 }
   0xd   : > { %s894_s20 = scalar_select %p751_p6, 1, 0 }
   0xe   : > { %p756_p8 = pnand %p429_p5, %p127_p7  ;;  %s680_s22 = smov [#allocation6]  }
   0xf   : > { %s143_s23 = sshll.u32 %s680_s22, 4  ;;  %s38_s25 = sadd.s32 1, %s674_s13  ;;  %s144_s23 = int_to_ptr.vmem [resolvable:$true] %s143_s23 }
  0x10   : > { %p471_p9 = pneg %p756_p8  ;;  %s551_s26 = scalar_lea.vmem %s144_s23, 512 }
  0x11   : > { %p552_p13 = scmp.ne.s32.totalorder %s144_s23, %s551_s26  ;;  %p559_p5 = scmp.lt.s32.totalorder %s144_s23, %s144_s23 }
  0x12   : > { %p765_p11 = pnand %p471_p9, %p736_p1  ;;  %p560_p7 = scmp.lt.s32.totalorder %s551_s26, %s551_s26 }
  0x14   : > { %p542_p12 = pneg %p765_p11  ;;  %p561_p6 = por %p560_p7, %p559_p5 }
  0x16   : > { %p554_p0 = pnand %p552_p13, %p542_p12 }
  0x18   : > { %p555_p3 = pneg %p554_p0 }
  0x1a   : > { %p562_p4 = pnand %p561_p6, %p555_p3 }
  0x1c   : > { %565 = shalt.err (!%p562_p4)
}
  0x1d   : > { %s681_s27 = smov 128   ;;  %s682_s28 = smov 8  }
  0x1e   : > { %474 = dma.hbm_to_vmem [thread:$0]  (!%p765_p11), %s888_s1, 512, %s144_s23, [#allocation7], %s681_s27, %s681_s27, %s682_s28  }
  0x1f   : > { %p40_p6 = scmp.ge.s32.totalorder %s38_s25, 2  ;;  %s47_s3 = sadd.s32 1, %s666_s11 }
  0x20   : > { %p54_p4 = scmp.ne.s32.totalorder %s666_s11, %s662_s10  ;;  %p55_p9 = scmp.eq.s32.totalorder %s678_s14, 0 }
  0x21   : > { %s909_s25 = smov (%p40_p6, %s38_s25), 0  ;;  %p484_p0 = scmp.lt.s32.totalorder %s678_s14, 2 }
  0x22   : > { %p783_p12 = por %p55_p9, %p54_p4  ;;  %p789_p13 = por %p740_p2, %p54_p4 }
  0x23   : > { %s42_s6 = ssub.s32 %s674_s13, %s909_s25  ;;  %s157_s7 = sand.u32 1, %s666_s11  }
  0x24   : > { %p45_p11 = scmp.eq.s32.totalorder %s42_s6, 0  ;;  %s432_s8 = sshll.u32 %s157_s7, 3 }
  0x25   : > { %s433_s16 = sshll.u32 %s674_s13, 7  ;;  %s161_s26 = scalar_lea.vmem [#allocation3], %s432_s8 }
  0x26   : > { %s798_s15 = scalar_select %p45_p11, %s666_s11, %s47_s3  }
  0x27   : > { %s167_s24 = scalar_lea.hbm %s887_s0, %s433_s16  ;;  %s169_s27 = sshll.u32 %s161_s26, 4  ;;  %s170_s27 = int_to_ptr.vmem [resolvable:$true] %s169_s27 }
  0x28   : > { %p806_p2 = pnand %p484_p0, %p783_p12  ;;  %s158_s28 = scalar_lea.sflag [#allocation4], %s157_s7 }
  0x29   : > { %s579_s29 = scalar_lea.vmem %s170_s27, 128  ;;  %s683_s30 = smov [#allocation3]  }
  0x2a   : > { %p568_p3 = pneg %p806_p2  ;;  %p580_p5 = scmp.ne.s32.totalorder %s170_s27, %s579_s29 }
  0x2b   : > { %s584_s3 = sshll.u32 %s683_s30, 4  ;;  %s585_s3 = int_to_ptr.vmem [resolvable:$false] %s584_s3 }
  0x2c   : > { %p582_p7 = pnand %p580_p5, %p568_p3  ;;  %s586_s6 = scalar_lea.vmem %s585_s3, 256 }
  0x2d   : > { %p587_p4 = scmp.lt.s32.totalorder %s170_s27, %s585_s3  ;;  %p588_p9 = scmp.lt.s32.totalorder %s586_s6, %s579_s29 }
  0x2e   : > { %p583_p6 = pneg %p582_p7 }
  0x2f   : > { %p589_p11 = por %p588_p9, %p587_p4 }
  0x31   : > { %p590_p10 = pnand %p589_p11, %p583_p6 }
  0x33   : > { %593 = shalt.err (!%p590_p10)
}
  0x34   : > { %478 = dma.hbm_to_vmem [thread:$0]  (!%p806_p2), %s167_s24, 128, %s170_s27, %s158_s28  }
  0x35   : > { %178 = sbr.rel (%p756_p8) target bundleno = 294 (0x126), region = 28  ;;  %s817_s4 = sand.u32 (!%p756_p8), 1, %s662_s10  }
  0x36   : > { %s435_s7 = sshll.u32 (!%p756_p8), %s817_s4, 3  ;;  %s181_s8 = scalar_lea.sflag (!%p756_p8), [#allocation4], %s817_s4 }
  0x37   : > { %s184_s16 = scalar_lea.vmem (!%p756_p8), [#allocation3], %s435_s7  ;;  %p900_p12 = scmp.ne.s32.totalorder (!%p756_p8), %s893_s19, 0 }
  0x3a   : > { %645 = dma.done.wait (%p900_p12), %s181_s8, 128  }
  0x3b   : > { %647 = vsyncadd (%p900_p12), %s181_s8, 4294967168 }
  0x3c   : > { %649 = dma.done.wait (%p736_p1), [#allocation7], 512  }
  0x3d   : > { %651 = vsyncadd (%p736_p1), [#allocation7], 4294966784  ;;  %vm214_vm0 = vcmask 261120   ;;  %v684_v0 = vmov 0.0   ;;  %vm685_vm1 = vmmov 0   ;;  %v221_v1 = vld [vmem:[#allocation6 + $0x18] sm:$0xff] }
  0x3e   : > { %452 = vmatprep.subr.mxu0 %v684_v0  ;;  %215 = vst.msk [vmem:[#allocation2] sm:$0xff] %vm214_vm0, %v684_v0  ;;  %460 = vmatprep.mubr.msk.f32.mxu0 %vm685_vm1, %v684_v0  ;;  %v220_v2 = vld [vmem:[#allocation6 + $0x10] sm:$0xff]  ;;  %v219_v3 = vld [vmem:[#allocation6 + $0x8] sm:$0xff]  ;;  %v218_v4 = vld [vmem:[#allocation6] sm:$0xff]  ;;  %s444_s17 = sshll.u32 %s670_s12, 7  ;;  %s208_s19 = scalar_lea.vmem [#allocation8], %s435_s7 }
  0x3f   : > { %453 = vmatpush3.xpose.msk.msra.mxu0 %vm214_vm0, %v221_v1  ;;  %v217_v5 = vld [vmem:[%s184_s16] sm:$0xff]  ;;  %s330_s21 = sshll.u32 %s208_s19, 4  ;;  %s844_s24 = scalar_lea.hbm %s889_s2, %s444_s17  ;;  %s331_s21 = int_to_ptr.vmem [resolvable:$true] %s330_s21 }
  0x40   : > { %454 = vmatprep.subr.mxu0 %v684_v0  ;;  %s316_s26 = scalar_lea.sflag [#allocation5], %s817_s4  ;;  %s594_s27 = scalar_lea.vmem %s331_s21, 128 }
  0x41   : > { %p595_p1 = scmp.ne.s32.totalorder %s331_s21, %s594_s27  ;;  %s686_s18 = smov [#allocation8]  }
  0x42   : > { %s598_s12 = sshll.u32 %s686_s18, 4  ;;  %s599_s12 = int_to_ptr.vmem [resolvable:$false] %s598_s12 }
  0x43   : > { %455 = vmatpush3.xpose.msk.msra.mxu0 %vm214_vm0, %v220_v2  ;;  %p596_p8 = pnand %p595_p1, %p789_p13  ;;  %s600_s28 = scalar_lea.vmem %s599_s12, 256 }
  0x44   : > { %456 = vmatprep.subr.mxu0 %v684_v0  ;;  %p601_p0 = scmp.lt.s32.totalorder %s331_s21, %s599_s12  ;;  %p602_p2 = scmp.lt.s32.totalorder %s600_s28, %s594_s27 }
  0x45   : > { %v216_v6 = vld [vmem:[#allocation2] sm:$0xff]  ;;  %p597_p10 = pneg %p596_p8 }
  0x46   : > { %p603_p3 = por %p602_p2, %p601_p0 }
  0x47   : > { %457 = vmatpush3.xpose.msk.msra.mxu0 %vm214_vm0, %v219_v3 }
  0x48   : > { %458 = vmatprep.subr.mxu0 %v684_v0  ;;  %p604_p5 = pnand %p603_p3, %p597_p10 }
  0x4b   : > { %459 = vmatpush3.xpose.msk.msra.mxu0 %vm214_vm0, %v218_v4 }
  0x4e   : > { %461 = vmatmul.mubr.msk.f32.vlgmr.msra.gmra.mxu0 %vm214_vm0, %v217_v5 }
 0x10e   : > { %v304_v7 = vpop.f32.mrf.mxu0 }
 0x10f   : > { %v308_v8 = vadd.f32 %v304_v7, %v216_v6 }
 0x110   : > { %v462_v9 = vpop.f32.mrf.mxu0 }
 0x111   : > { %309 = vst.msk [vmem:[#allocation2] sm:$0xff] %vm214_vm0, %v308_v8 }
 0x118   : > { %v313_v10 = vld [vmem:[#allocation2] sm:$0xff] }
 0x119   : > { %314 = vst.msk [vmem:[%s208_s19] sm:$0xff] %vm214_vm0, %v313_v10 }
 0x11a   : > { %607 = shalt.err (!%p604_p5)
}
 0x11b   : > { %s608_s29 = scalar_lea.hbm %s844_s24, 128  ;;  %s612_s6 = scalar_lea.hbm %s889_s2, 256 }
 0x11c   : > { %p609_p7 = scmp.ne.s32.totalorder %s844_s24, %s608_s29  ;;  %p613_p9 = scmp.lt.s32.totalorder %s844_s24, %s889_s2 }
 0x11d   : > { %p614_p11 = scmp.lt.s32.totalorder %s612_s6, %s608_s29 }
 0x11e   : > { %p610_p6 = pnand %p609_p7, %p789_p13 }
 0x11f   : > { %p615_p12 = por %p614_p11, %p613_p9 }
 0x120   : > { %p611_p4 = pneg %p610_p6 }
 0x122   : > { %p616_p1 = pnand %p615_p12, %p611_p4 }
 0x124   : > { %619 = shalt.err (!%p616_p1)
}
 0x125   : > { %469 = dma.vmem_to_hbm [thread:$0]  (%p789_p13), %s331_s21, 128, %s844_s24, %s316_s26  }
 0x126 PF: > { %s342_s8 = sand.u32 1, %s658_s9   ;;  %p901_p8 = scmp.ne.s32.totalorder %s894_s20, 0 }
 0x127   : > { %p902_p10 = scmp.ge.s32.totalorder %s678_s14, 2  ;;  %s343_s16 = scalar_lea.sflag [#allocation5], %s342_s8 }
 0x129   : > { %p480_p0 = pnand %p902_p10, %p901_p8 }
 0x12b   : > { %p481_p2 = pneg %p480_p0 }
 0x12d   : > { %653 = dma.done.wait (%p481_p2), %s343_s16, 128  }
 0x12e   : > { %655 = vsyncadd (%p481_p2), %s343_s16, 4294967168  ;;  %s19_s14 = sadd.s32 1, %s678_s14   ;;  %s903_s9 = smov %s662_s10 }
 0x12f   : > { %p16_p3 = scmp.ge.s32.totalorder %s19_s14, 4   ;;  %s904_s10 = smov %s666_s11 }
 0x130   : > { %s905_s11 = smov %s798_s15  ;;  %s906_s12 = smov %s674_s13 }
 0x131   : > { %s907_s13 = smov %s909_s25  ;;  %18 = sbr.rel (!%p16_p3) target bundleno = 7 (0x7), region = 86 }
 0x136   :  { %348 = vsyncpa [#allocation4], 1 }
 0x137   :  { %350 = vsyncpa [#allocation4 + $0x1], 1 }
 0x138   :  { %351 = vsyncpa [#allocation7], 1 }
 0x139   :  { %352 = vsyncpa [#allocation5], 1 }
 0x13a   :  { %354 = vsyncpa [#allocation5 + $0x1], 1 }

</bundles_post_ra>
